<compile_context>
chip_gen: v5e
topology: v5e:2x2
jax: 0.10.0
libtpu: 0.0.40
codegen_flags: <defaults>
</compile_context>

<pallas_src>
import functools

import jax
import jax.numpy as jnp
import numpy as np
from jax.experimental import pallas as pl
from jax.experimental.pallas import tpu as pltpu

LANE = 128
SUBLANE = 8
# Single-buffer grid-invariant weight blocks only once they are big enough for
# the VMEM saving to matter (feedback: irrelevant below ~1 MiB of params).
_SINGLE_BUFFER_WEIGHT_BYTES = 1 << 20


def _round_up(x, m):
    return ((x + m - 1) // m) * m


def _choose_tm(batch):
    """Adaptive batch-tile size.

    Largest power-of-two tile in [8, 512] (sublane aligned) whose batch
    padding waste is <=~10%; then, if the batch spans at least two sublane
    tiles, cap it so the grid has >=2 steps (v7x megacore; no-op cost on
    v5e/v6e beyond one ~0.35us grid step).
    """
    batch_sub = _round_up(batch, SUBLANE)
    tm = SUBLANE
    cand = SUBLANE
    while cand <= min(512, batch_sub):
        if _round_up(batch, cand) <= max(batch_sub, int(batch * 1.1)):
            tm = cand
        cand *= 2
    if batch_sub >= 2 * SUBLANE:
        half = _round_up((batch_sub + 1) // 2, SUBLANE)
        tm = min(tm, half)
    return tm


def _mlp_kernel(num_fc_layers, *refs):
    """Fused MLP forward on one batch tile.

    refs = (x_ref, w0, b0, [w_fc_i, b_fc_i]*num_fc_layers, w_out, b_out, o_ref)

    Semantics match MyCustomModel.forward:
      out = input_layer(x)                      # NO activation
      for fc in fc_layers: out = relu(fc(out))  # activation after each fc
      out = output_layer(out)                   # NO activation
    """
    x_ref = refs[0]
    o_ref = refs[-1]
    p = refs[1:-1]  # alternating (w, b); w is bf16, b is f32

    # input_layer (no activation): bf16 x bf16 MXU matmul, f32 accumulate
    h = (
        jnp.dot(x_ref[...], p[0][...], preferred_element_type=jnp.float32)
        + p[1][...]
    )

    # hidden fc_layers, relu after each
    for i in range(num_fc_layers):
        w_ref = p[2 + 2 * i]
        b_ref = p[3 + 2 * i]
        h = (
            jnp.dot(
                h.astype(jnp.bfloat16), w_ref[...],
                preferred_element_type=jnp.float32,
            )
            + b_ref[...]
        )
        h = jnp.maximum(h, 0.0)

    # output_layer (no activation) — bias add fused into the output store
    o_ref[...] = (
        jnp.dot(
            h.astype(jnp.bfloat16), p[-2][...],
            preferred_element_type=jnp.float32,
        )
        + p[-1][...]
    ).astype(o_ref.dtype)


def prepare_params(params, input_size):
    """One-time preparation (hoisted out of the per-call path).

    params: list of (weight(in,out) f32, bias(1,out) f32) tuples, layer order.
    Returns list of (w_pad bf16 (K_pad, N_pad), b_pad f32 (1, N_pad)) with all
    feature dims zero-padded to multiples of 128 (lane-dense, inert padding).
    """
    prev = _round_up(input_size, LANE)
    padded = []
    for w, b in params:
        fin, fout = w.shape
        fout_pad = _round_up(fout, LANE)
        w_pad = (
            jnp.zeros((prev, fout_pad), jnp.bfloat16)
            .at[:fin, :fout]
            .set(w.astype(jnp.bfloat16))
        )
        b_pad = (
            jnp.zeros((1, fout_pad), jnp.float32)
            .at[:, :fout]
            .set(b.astype(jnp.float32))
        )
        padded.append((w_pad, b_pad))
        prev = fout_pad
    return padded


@functools.partial(jax.jit, static_argnames=("out_features",))
def mlp_forward(x, padded_params, out_features):
    """x: (batch, in_features) f32.  padded_params: output of prepare_params.
    Returns f32 (batch, out_features).  Fully jitted: pad -> kernel -> slice
    is one dispatch."""
    batch, in_features = x.shape
    in_pad = padded_params[0][0].shape[0]
    out_pad = padded_params[-1][0].shape[1]
    num_fc_layers = len(padded_params) - 2  # exclude input_layer, output_layer

    tm = _choose_tm(batch)
    batch_pad = _round_up(batch, tm)
    grid = (batch_pad // tm,)

    x_pad = (
        jnp.zeros((batch_pad, in_pad), jnp.bfloat16)
        .at[:batch, :in_features]
        .set(x.astype(jnp.bfloat16))
    )

    flat_params = [t for wb in padded_params for t in wb]
    param_bytes = sum(int(p.size) * p.dtype.itemsize for p in flat_params)

    # Grid-invariant weights/biases: single-buffer once big enough to matter.
    weight_mode = (
        pl.Buffered(1) if param_bytes > _SINGLE_BUFFER_WEIGHT_BYTES else None
    )

    vmem = pltpu.MemorySpace.VMEM
    in_specs = [pl.BlockSpec((tm, in_pad), lambda i: (i, 0), memory_space=vmem)]
    for p in flat_params:
        in_specs.append(
            pl.BlockSpec(
                p.shape,
                lambda i: (0, 0),
                memory_space=vmem,
                pipeline_mode=weight_mode,
            )
        )
    out_spec = pl.BlockSpec((tm, out_pad), lambda i: (i, 0), memory_space=vmem)

    # Explicit VMEM budget: double-buffered x/out tiles + (single|double)
    # buffered weights, 2x headroom, capped at 48 MiB (v7x has 64 MiB physical).
    weight_bufs = 1 if weight_mode is not None else 2
    tile_bytes = 2 * tm * in_pad * 2 + 2 * tm * out_pad * 4
    needed = tile_bytes + weight_bufs * param_bytes
    vmem_limit = int(min(48 << 20, max(2 * needed + (1 << 20), 16 << 20)))

    flops = 2 * batch_pad * sum(
        w.shape[0] * w.shape[1] for w, _ in padded_params
    )
    bytes_accessed = (
        x_pad.size * x_pad.dtype.itemsize
        + param_bytes
        + batch_pad * out_pad * 4
    )
    cost = pl.CostEstimate(
        flops=flops, transcendentals=0, bytes_accessed=bytes_accessed
    )

    out_padded = pl.pallas_call(
        functools.partial(_mlp_kernel, num_fc_layers),
        out_shape=jax.ShapeDtypeStruct((batch_pad, out_pad), jnp.float32),
        grid=grid,
        in_specs=in_specs,
        out_specs=out_spec,
        compiler_params=pltpu.CompilerParams(
            dimension_semantics=("parallel",),
            vmem_limit_bytes=vmem_limit,
        ),
        cost_estimate=cost,
    )(x_pad, *flat_params)

    return out_padded[:batch, :out_features]


def init_linear_params(key, in_features, out_features):
    """PyTorch nn.Linear default init: U(-1/sqrt(in), 1/sqrt(in))."""
    kw, kb = jax.random.split(key)
    bound = 1.0 / np.sqrt(in_features)
    # stored already transposed to (in, out) for x @ W
    w = jax.random.uniform(
        kw, (in_features, out_features), jnp.float32, -bound, bound
    )
    b = jax.random.uniform(kb, (1, out_features), jnp.float32, -bound, bound)
    return w, b


def build_params(key, input_size, hidden_sizes, output_size):
    sizes = [input_size] + list(hidden_sizes) + [output_size]
    params = []
    for fin, fout in zip(sizes[:-1], sizes[1:]):
        key, sub = jax.random.split(key)
        params.append(init_linear_params(sub, fin, fout))
    return params


def reference_forward(x, params):
    """Pure-JAX f32 reference mirroring MyCustomModel.forward exactly."""
    w0, b0 = params[0]
    out = x @ w0 + b0  # input_layer, no activation
    for w, b in params[1:-1]:
        out = out @ w + b
        out = jnp.maximum(out, 0.0)  # relu after each fc layer
    w_out, b_out = params[-1]
    out = out @ w_out + b_out  # output_layer, no activation
    return out


if __name__ == "__main__":
    # MyCustomModel(input_size=32, output_size=8, hidden_sizes=(32, 32), activation=relu)
    input_size = 32
    hidden_sizes = (32, 32)
    output_size = 8

    key = jax.random.PRNGKey(0)
    key_x, key_x2, key_p = jax.random.split(key, 3)
    params = build_params(key_p, input_size, hidden_sizes, output_size)
    padded_params = prepare_params(params, input_size)  # one-time prep

    # --- small shipped-size batch (single tile) ---
    batch = 8
    x = jax.random.normal(key_x, (batch, input_size), jnp.float32)
    out = mlp_forward(x, padded_params, output_size)
    out = jax.block_until_ready(out)
    assert out.shape == (batch, output_size)
    ref = reference_forward(x, params)
    np.testing.assert_allclose(
        np.asarray(out), np.asarray(ref), rtol=5e-2, atol=5e-2
    )

    # --- non-multiple-of-8 batch: exercises row padding + multi-tile grid ---
    batch2 = 13
    x2 = jax.random.normal(key_x2, (batch2, input_size), jnp.float32)
    out2 = jax.block_until_ready(mlp_forward(x2, padded_params, output_size))
    assert out2.shape == (batch2, output_size)
    ref2 = reference_forward(x2, params)
    np.testing.assert_allclose(
        np.asarray(out2), np.asarray(ref2), rtol=5e-2, atol=5e-2
    )

    print("KERNEL_OK")
</pallas_src>

<mosaic_0001>
module attributes {stable_mosaic.version = 11 : i64} {
  func.func @_mlp_kernel(%arg0: i32, %arg1: memref<8x128xbf16, #tpu.memory_space<vmem>>, %arg2: memref<128x128xbf16, #tpu.memory_space<vmem>>, %arg3: memref<1x128xf32, #tpu.memory_space<vmem>>, %arg4: memref<128x128xbf16, #tpu.memory_space<vmem>>, %arg5: memref<1x128xf32, #tpu.memory_space<vmem>>, %arg6: memref<128x128xbf16, #tpu.memory_space<vmem>>, %arg7: memref<1x128xf32, #tpu.memory_space<vmem>>, %arg8: memref<8x128xf32, #tpu.memory_space<vmem>>) attributes {dimension_semantics = [#tpu.dimension_semantics<parallel>], iteration_bounds = array<i64: 1>, scalar_prefetch = 0 : i64, scratch_operands = 0 : i64, tpu.core_type = #tpu.core_type<tc>, window_params = [{transform_indices = @transform_0, window_bounds = array<i64: 8, 128>}, {pipeline_mode = #tpu.pipeline_mode<synchronous>, transform_indices = @transform_1, window_bounds = array<i64: 128, 128>}, {pipeline_mode = #tpu.pipeline_mode<synchronous>, transform_indices = @transform_2, window_bounds = array<i64: 1, 128>}, {pipeline_mode = #tpu.pipeline_mode<synchronous>, transform_indices = @transform_3, window_bounds = array<i64: 128, 128>}, {pipeline_mode = #tpu.pipeline_mode<synchronous>, transform_indices = @transform_4, window_bounds = array<i64: 1, 128>}, {pipeline_mode = #tpu.pipeline_mode<synchronous>, transform_indices = @transform_5, window_bounds = array<i64: 128, 128>}, {pipeline_mode = #tpu.pipeline_mode<synchronous>, transform_indices = @transform_6, window_bounds = array<i64: 1, 128>}, {transform_indices = @transform_7, window_bounds = array<i64: 8, 128>}]} {
    %c0 = arith.constant 0 : index
    %c0_0 = arith.constant 0 : index
    %0 = vector.load %arg1[%c0, %c0_0] : memref<8x128xbf16, #tpu.memory_space<vmem>>, vector<8x128xbf16>
    %c0_1 = arith.constant 0 : index
    %c0_2 = arith.constant 0 : index
    %1 = vector.load %arg2[%c0_1, %c0_2] : memref<128x128xbf16, #tpu.memory_space<vmem>>, vector<128x128xbf16>
    %cst = arith.constant dense<0.000000e+00> : vector<8x128xf32>
    %2 = tpu.matmul %0, %1, %cst {dimension_numbers = #tpu.dot_dimension_numbers<[1], [0], [0], [1], [0, 0, 1, 1], [], []>} : vector<8x128xbf16>, vector<128x128xbf16>, vector<8x128xf32> -> vector<8x128xf32>
    %c0_3 = arith.constant 0 : index
    %c0_4 = arith.constant 0 : index
    %3 = vector.load %arg3[%c0_3, %c0_4] : memref<1x128xf32, #tpu.memory_space<vmem>>, vector<1x128xf32>
    %4 = vector.broadcast %3 : vector<1x128xf32> to vector<8x128xf32>
    %5 = arith.addf %2, %4 : vector<8x128xf32>
    %6 = arith.truncf %5 : vector<8x128xf32> to vector<8x128xbf16>
    %c0_5 = arith.constant 0 : index
    %c0_6 = arith.constant 0 : index
    %7 = vector.load %arg4[%c0_5, %c0_6] : memref<128x128xbf16, #tpu.memory_space<vmem>>, vector<128x128xbf16>
    %cst_7 = arith.constant dense<0.000000e+00> : vector<8x128xf32>
    %8 = tpu.matmul %6, %7, %cst_7 {dimension_numbers = #tpu.dot_dimension_numbers<[1], [0], [0], [1], [0, 0, 1, 1], [], []>} : vector<8x128xbf16>, vector<128x128xbf16>, vector<8x128xf32> -> vector<8x128xf32>
    %c0_8 = arith.constant 0 : index
    %c0_9 = arith.constant 0 : index
    %9 = vector.load %arg5[%c0_8, %c0_9] : memref<1x128xf32, #tpu.memory_space<vmem>>, vector<1x128xf32>
    %10 = vector.broadcast %9 : vector<1x128xf32> to vector<8x128xf32>
    %11 = arith.addf %8, %10 : vector<8x128xf32>
    %cst_10 = arith.constant 0.000000e+00 : f32
    %12 = vector.broadcast %cst_10 : f32 to vector<8x128xf32>
    %13 = arith.maximumf %11, %12 : vector<8x128xf32>
    %14 = arith.truncf %13 : vector<8x128xf32> to vector<8x128xbf16>
    %c0_11 = arith.constant 0 : index
    %c0_12 = arith.constant 0 : index
    %15 = vector.load %arg6[%c0_11, %c0_12] : memref<128x128xbf16, #tpu.memory_space<vmem>>, vector<128x128xbf16>
    %cst_13 = arith.constant dense<0.000000e+00> : vector<8x128xf32>
    %16 = tpu.matmul %14, %15, %cst_13 {dimension_numbers = #tpu.dot_dimension_numbers<[1], [0], [0], [1], [0, 0, 1, 1], [], []>} : vector<8x128xbf16>, vector<128x128xbf16>, vector<8x128xf32> -> vector<8x128xf32>
    %c0_14 = arith.constant 0 : index
    %c0_15 = arith.constant 0 : index
    %17 = vector.load %arg7[%c0_14, %c0_15] : memref<1x128xf32, #tpu.memory_space<vmem>>, vector<1x128xf32>
    %18 = vector.broadcast %17 : vector<1x128xf32> to vector<8x128xf32>
    %19 = arith.addf %16, %18 : vector<8x128xf32>
    %c0_16 = arith.constant 0 : index
    %c0_17 = arith.constant 0 : index
    %20 = vector.load %arg8[%c0_16, %c0_17] : memref<8x128xf32, #tpu.memory_space<vmem>>, vector<8x128xf32>
    tpu.vector_store %arg8[%c0_16, %c0_17], %19 {strides = array<i32>} : memref<8x128xf32, #tpu.memory_space<vmem>>, vector<8x128xf32>,
    return
  }
  func.func @transform_0(%arg0: i32) -> (i32, i32) {
    %c0_i32 = arith.constant 0 : i32
    %c0_i32_0 = arith.constant 0 : i32
    return %arg0, %c0_i32 : i32, i32
  }
  func.func @transform_1(%arg0: i32) -> (i32, i32) {
    %c0_i32 = arith.constant 0 : i32
    %c0_i32_0 = arith.constant 0 : i32
    %c0_i32_1 = arith.constant 0 : i32
    return %c0_i32, %c0_i32_0 : i32, i32
  }
  func.func @transform_2(%arg0: i32) -> (i32, i32) {
    %c0_i32 = arith.constant 0 : i32
    %c0_i32_0 = arith.constant 0 : i32
    %c0_i32_1 = arith.constant 0 : i32
    return %c0_i32, %c0_i32_0 : i32, i32
  }
  func.func @transform_3(%arg0: i32) -> (i32, i32) {
    %c0_i32 = arith.constant 0 : i32
    %c0_i32_0 = arith.constant 0 : i32
    %c0_i32_1 = arith.constant 0 : i32
    return %c0_i32, %c0_i32_0 : i32, i32
  }
  func.func @transform_4(%arg0: i32) -> (i32, i32) {
    %c0_i32 = arith.constant 0 : i32
    %c0_i32_0 = arith.constant 0 : i32
    %c0_i32_1 = arith.constant 0 : i32
    return %c0_i32, %c0_i32_0 : i32, i32
  }
  func.func @transform_5(%arg0: i32) -> (i32, i32) {
    %c0_i32 = arith.constant 0 : i32
    %c0_i32_0 = arith.constant 0 : i32
    %c0_i32_1 = arith.constant 0 : i32
    return %c0_i32, %c0_i32_0 : i32, i32
  }
  func.func @transform_6(%arg0: i32) -> (i32, i32) {
    %c0_i32 = arith.constant 0 : i32
    %c0_i32_0 = arith.constant 0 : i32
    %c0_i32_1 = arith.constant 0 : i32
    return %c0_i32, %c0_i32_0 : i32, i32
  }
  func.func @transform_7(%arg0: i32) -> (i32, i32) {
    %c0_i32 = arith.constant 0 : i32
    %c0_i32_0 = arith.constant 0 : i32
    return %arg0, %c0_i32 : i32, i32
  }
}

</mosaic_0001>

<bundles_post_ra>
// kernel: mlp_forward.1
= control target key start
LH: loop header
LB: loop body
LE: loop exit
PB: predicated region body
PF: predicated region fallthrough
CT: control target
= control target key end

     0   :  { %12 = vsyncpa [#allocation3], 0  ;;  %s641_s0 = inlined_call_operand.vmem [shape: bf16[8,128], index: 0, kind: input, shape index: {}]   ;;  %s642_s1 = inlined_call_operand.hbm [shape: bf16[128,128], index: 1, kind: input, shape index: {}]   ;;  %s643_s2 = inlined_call_operand.vmem [shape: f32[1,128], index: 2, kind: input, shape index: {}]   ;;  %s644_s3 = inlined_call_operand.hbm [shape: bf16[128,128], index: 3, kind: input, shape index: {}]   ;;  %s645_s4 = inlined_call_operand.vmem [shape: f32[1,128], index: 4, kind: input, shape index: {}]   ;;  %s646_s5 = inlined_call_operand.hbm [shape: bf16[128,128], index: 5, kind: input, shape index: {}]   ;;  %s647_s6 = inlined_call_operand.vmem [shape: f32[1,128], index: 6, kind: input, shape index: {}]   ;;  %s648_s7 = inlined_call_operand.hbm [shape: f32[8,128], index: 7, kind: output, shape index: {}]  }
   0x1   :  { %13 = vsyncpa [#allocation6], 0 }
   0x2   :  { %14 = vsyncpa [#allocation4], 0  ;;  %s36_s26 = sshll.u32 %s644_s3, 4  ;;  %s571_s27 = smov [#allocation5]   ;;  %s37_s26 = int_to_ptr.hbm [resolvable:$true] %s36_s26 }
   0x3   :  { %s38_s28 = sshll.u32 %s571_s27, 4  ;;  %s21_s8 = sshll.u32 %s642_s1, 4  ;;  %s39_s28 = int_to_ptr.vmem [resolvable:$true] %s38_s28  ;;  %s22_s8 = int_to_ptr.hbm [resolvable:$true] %s21_s8 }
   0x4   :  { %s572_s9 = smov 64   ;;  %s573_s10 = smov 4  }
   0x5   :  { %44 = dma.hbm_to_vmem [thread:$0]  %s37_s26, 1024, %s39_s28, [#allocation6], %s572_s9, %s572_s9, %s573_s10  }
   0x6   :  { %s574_s11 = smov [#allocation2]   ;;  %s51_s15 = sshll.u32 %s646_s5, 4  ;;  %s52_s15 = int_to_ptr.hbm [resolvable:$true] %s51_s15 }
   0x7   :  { %s23_s12 = sshll.u32 %s574_s11, 4  ;;  %s575_s3 = smov [#allocation7]   ;;  %s24_s12 = int_to_ptr.vmem [resolvable:$true] %s23_s12 }
   0x8   :  { %29 = dma.hbm_to_vmem [thread:$0]  %s22_s8, 1024, %s24_s12, [#allocation3], %s572_s9, %s572_s9, %s573_s10  }
   0x9   :  { %s53_s16 = sshll.u32 %s575_s3, 4  ;;  %s54_s16 = int_to_ptr.vmem [resolvable:$true] %s53_s16 }
   0xa   :  { %59 = dma.hbm_to_vmem [thread:$0]  %s52_s15, 1024, %s54_s16, [#allocation6], %s572_s9, %s572_s9, %s573_s10  }
   0xb   :  { %565 = dma.done.wait [#allocation3], 1024  }
   0xc   :  { %566 = vsyncadd [#allocation3], 4294966272 }
   0xd   :  { %567 = dma.done.wait [#allocation6], 2048  }
   0xe   :  { %568 = vsyncadd [#allocation6], 4294965248  ;;  %v443_v0 = vld [vmem:[#allocation2 + $0x38] sm:$0xff]  ;;  %v442_v1 = vld [vmem:[#allocation2 + $0x30] sm:$0xff]  ;;  %s576_s21 = smov [#allocation8]   ;;  %s329_s25 = sshll.u32 %s648_s7, 4  ;;  %s330_s25 = int_to_ptr.hbm [resolvable:$true] %s329_s25 }
   0xf   :  { %143 = vmatpush.bf16.msra.mxu0 %v443_v0  ;;  %v451_v2 = vld [vmem:[#allocation5 + $0x38] sm:$0xff]  ;;  %v450_v3 = vld [vmem:[#allocation5 + $0x30] sm:$0xff]  ;;  %v441_v4 = vld [vmem:[#allocation2 + $0x28] sm:$0xff]  ;;  %s327_s22 = sshll.u32 %s576_s21, 4  ;;  %s328_s22 = int_to_ptr.vmem [resolvable:$true] %s327_s22 }
  0x10   :  { %225 = vmatpush.bf16.msra.mxu1 %v451_v2  ;;  %v449_v5 = vld [vmem:[#allocation5 + $0x28] sm:$0xff]  ;;  %v440_v6 = vld [vmem:[#allocation2 + $0x20] sm:$0xff]  ;;  %v439_v8 = vld [vmem:[#allocation2 + $0x18] sm:$0xff] }
  0x11   :  { %v448_v7 = vld [vmem:[#allocation5 + $0x20] sm:$0xff]  ;;  %v447_v9 = vld [vmem:[#allocation5 + $0x18] sm:$0xff]  ;;  %v438_v10 = vld [vmem:[#allocation2 + $0x10] sm:$0xff] }
  0x12   :  { %v446_v11 = vld [vmem:[#allocation5 + $0x10] sm:$0xff]  ;;  %v437_v12 = vld [vmem:[#allocation2 + $0x8] sm:$0xff]  ;;  %v436_v14 = vld [vmem:[#allocation2] sm:$0xff] }
  0x13   :  { %144 = vmatpush.bf16.msra.mxu0 %v442_v1  ;;  %v445_v13 = vld [vmem:[#allocation5 + $0x8] sm:$0xff]  ;;  %v74_v15 = vld [vmem:[%s641_s0] sm:$0xf]  ;;  %v459_v17 = vld [vmem:[#allocation7 + $0x38] sm:$0xff] }
  0x14   :  { %226 = vmatpush.bf16.msra.mxu1 %v450_v3  ;;  %v444_v16 = vld [vmem:[#allocation5] sm:$0xff]  ;;  %308 = vmatpush.bf16.msra.mxu2 %v459_v17  ;;  %v458_v18 = vld [vmem:[#allocation7 + $0x30] sm:$0xff]  ;;  %v457_v19 = vld [vmem:[#allocation7 + $0x28] sm:$0xff] }
  0x15   :  { %v456_v20 = vld [vmem:[#allocation7 + $0x20] sm:$0xff]  ;;  %v455_v21 = vld [vmem:[#allocation7 + $0x18] sm:$0xff]  ;;  %v454_v22 = vld [vmem:[#allocation7 + $0x10] sm:$0xff] }
  0x16   :  { %v466_v23 = vld [vmem:[%s643_s2] ss:$0 sm:$0xff]  ;;  %v453_v28 = vld [vmem:[#allocation7 + $0x8] sm:$0xff] }
  0x17   :  { %145 = vmatpush.bf16.msra.mxu0 %v441_v4  ;;  %v452_v29 = vld [vmem:[#allocation7] sm:$0xff] }
  0x18   :  { %227 = vmatpush.bf16.msra.mxu1 %v449_v5  ;;  %309 = vmatpush.bf16.msra.mxu2 %v458_v18  ;;  %v467_v30 = vld [vmem:[%s645_s4] ss:$0 sm:$0xff] }
  0x19   :  { %v468_v36 = vld [vmem:[%s647_s6] ss:$0 sm:$0xff] }
  0x1b   :  { %146 = vmatpush.bf16.msra.mxu0 %v440_v6 }
  0x1c   :  { %228 = vmatpush.bf16.msra.mxu1 %v448_v7  ;;  %310 = vmatpush.bf16.msra.mxu2 %v457_v19 }
  0x1f   :  { %147 = vmatpush.bf16.msra.mxu0 %v439_v8 }
  0x20   :  { %229 = vmatpush.bf16.msra.mxu1 %v447_v9  ;;  %311 = vmatpush.bf16.msra.mxu2 %v456_v20 }
  0x23   :  { %148 = vmatpush.bf16.msra.mxu0 %v438_v10 }
  0x24   :  { %230 = vmatpush.bf16.msra.mxu1 %v446_v11  ;;  %312 = vmatpush.bf16.msra.mxu2 %v455_v21 }
  0x27   :  { %149 = vmatpush.bf16.msra.mxu0 %v437_v12 }
  0x28   :  { %231 = vmatpush.bf16.msra.mxu1 %v445_v13  ;;  %313 = vmatpush.bf16.msra.mxu2 %v454_v22 }
  0x2b   :  { %150 = vmatpush.bf16.msra.mxu0 %v436_v14 }
  0x2c   :  { %232 = vmatpush.bf16.msra.mxu1 %v444_v16  ;;  %314 = vmatpush.bf16.msra.mxu2 %v453_v28 }
  0x2e   :  { %151 = vmatmul.bf16.vlgmr.msra.gmra.mxu0 %v74_v15 }
  0x30   :  { %315 = vmatpush.bf16.msra.mxu2 %v452_v29 }
  0xab   :  { %v152_v24 = vpop.f32.mrf.mxu0 }
  0xac   :  { %v153_v25 = vadd.f32 %v466_v23, %v152_v24 }
  0xae   :  { %v156_v26 = vpack.c.bf16 %v153_v25, %v153_v25 }
  0xb0   :  { %233 = vmatmul.bf16.vlgmr.msra.gmra.mxu1 %v156_v26 }
  0xb3   :  { %v154_v27 = vpop.f32.mrf.mxu0 }
 0x12d   :  { %v234_v31 = vpop.f32.mrf.mxu1 }
 0x12e   :  { %v235_v32 = vadd.f32 %v467_v30, %v234_v31 }
 0x130   :  { %v238_v33 = vmax.f32 %v235_v32, 0.0 }
 0x132   :  { %v239_v34 = vpack.c.bf16 %v238_v33, %v238_v33 }
 0x134   :  { %316 = vmatmul.bf16.vlgmr.msra.gmra.mxu2 %v239_v34 }
 0x135   :  { %v236_v35 = vpop.f32.mrf.mxu1 }
 0x1b7   :  { %v317_v37 = vpop.f32.mrf.mxu2 }
 0x1b8   :  { %v318_v38 = vadd.f32 %v468_v36, %v317_v37 }
 0x1ba   :  { %321 = vst [vmem:[#allocation8] sm:$0xff] %v318_v38 }
 0x1bb   :  { %332 = dma.vmem_to_hbm [thread:$0]  %s328_s22, 128, %s330_s25, [#allocation4]  }
 0x1bf   :  { %v319_v39 = vpop.f32.mrf.mxu2 }
 0x1c0   :  { %569 = dma.done.wait [#allocation4], 128  }
 0x1c1   :  { %570 = vsyncadd [#allocation4], 4294967168 }
 0x1c2   :  { %337 = vsyncpa [#allocation3], 1 }
 0x1c3   :  { %338 = vsyncpa [#allocation6], 1 }
 0x1c4   :  { %339 = vsyncpa [#allocation4], 1 }

</bundles_post_ra>
